<compile_context>
chip_gen: v5e
topology: v5e:2x2
jax: 0.10.0
libtpu: 0.0.40
codegen_flags: <defaults>
</compile_context>

<pallas_src>
import functools

import jax
import jax.numpy as jnp
from jax.experimental import pallas as pl
from jax.experimental.pallas import tpu as pltpu

BN_EPS = 1e-5
LANE = 128
SUBLANE = 8
TM_TARGET = 1024   # rows of the im2col matrix per grid step


def _round_up(x, m):
    return (x + m - 1) // m * m


# ----------------------------------------------------------------------------
# Pass 1: per-tile partial sum / sum-of-squares of y = X @ W  (y never hits HBM)
# ----------------------------------------------------------------------------
def _stats_kernel(x_ref, w_ref, sum_ref, ssq_ref):
    y = jnp.dot(x_ref[...], w_ref[...], preferred_element_type=jnp.float32)
    # M-padding rows of X are zero -> y is zero there -> no masking needed.
    s = jnp.sum(y, axis=0, keepdims=True)            # (1, Co_pad)
    q = jnp.sum(y * y, axis=0, keepdims=True)        # (1, Co_pad)
    sum_ref[...] = jnp.broadcast_to(s, sum_ref.shape)   # lane-dense (8,128) store
    ssq_ref[...] = jnp.broadcast_to(q, ssq_ref.shape)


# ----------------------------------------------------------------------------
# Pass 2: recompute y = X @ W (MXU work is ~free; kernel is HBM-bound),
#         then BN affine (scale/shift folded from global stats) + ReLU.
# ----------------------------------------------------------------------------
def _matmul_bn_relu_kernel(x_ref, w_ref, scale_ref, shift_ref, o_ref):
    y = jnp.dot(x_ref[...], w_ref[...], preferred_element_type=jnp.float32)
    out = y * scale_ref[...] + shift_ref[...]
    o_ref[...] = jnp.maximum(out, 0.0).astype(o_ref.dtype)


# ----------------------------------------------------------------------------
# Fused conv(im2col-matmul) + BatchNorm(train) + ReLU
# ----------------------------------------------------------------------------
def _fused_cna_matmul(cols_bf16, w_mat, gamma, beta, m_valid):
    # cols_bf16: (M, Kd) bf16, w_mat: (Kd, Co) f32, gamma/beta: (Co,)
    M_in, Kd = cols_bf16.shape
    Co = w_mat.shape[1]
    Co_pad = _round_up(Co, LANE)

    # Tile M so the "parallel" grid axis always has >= 2 steps (megacore on v7x),
    # aiming for >= 4, capped at TM_TARGET, multiple of 8 (sublane).
    m8 = _round_up(m_valid, SUBLANE)
    tm = min(TM_TARGET, max(SUBLANE, _round_up(pl.cdiv(m8, 4), SUBLANE)))
    M_pad = _round_up(m_valid, tm)
    nt = M_pad // tm

    x_p = cols_bf16
    if M_pad != m_valid:
        x_p = jnp.pad(cols_bf16, ((0, M_pad - m_valid), (0, 0)))     # zero rows
    w_p = jnp.zeros((Kd, Co_pad), jnp.bfloat16).at[:, :Co].set(w_mat.astype(jnp.bfloat16))
    g_p = jnp.ones((Co_pad,), jnp.float32).at[:Co].set(gamma)
    b_p = jnp.zeros((Co_pad,), jnp.float32).at[:Co].set(beta)

    cparams = pltpu.CompilerParams(
        dimension_semantics=("parallel",),
        vmem_limit_bytes=32 * 1024 * 1024,
    )

    # Kd full-extent blocks: no 128-padding of the activation matrix in HBM.
    x_spec = pl.BlockSpec((tm, Kd), lambda i: (i, 0))
    w_spec = pl.BlockSpec((Kd, Co_pad), lambda i: (0, 0))

    psum, pssq = pl.pallas_call(
        _stats_kernel,
        out_shape=(
            jax.ShapeDtypeStruct((nt * SUBLANE, Co_pad), jnp.float32),
            jax.ShapeDtypeStruct((nt * SUBLANE, Co_pad), jnp.float32),
        ),
        grid_spec=pltpu.PrefetchScalarGridSpec(
            num_scalar_prefetch=0,
            grid=(nt,),
            in_specs=[x_spec, w_spec],
            out_specs=(
                pl.BlockSpec((SUBLANE, Co_pad), lambda i: (i, 0)),
                pl.BlockSpec((SUBLANE, Co_pad), lambda i: (i, 0)),
            ),
        ),
        compiler_params=cparams,
        cost_estimate=pl.CostEstimate(
            flops=2 * M_pad * Kd * Co_pad,
            transcendentals=0,
            bytes_accessed=M_pad * Kd * 2 + Kd * Co_pad * 2 + 2 * nt * SUBLANE * Co_pad * 4,
        ),
    )(x_p, w_p)

    # Global batch statistics: tiny per-channel reduction of per-tile partials (plain JAX).
    total_sum = psum.reshape(nt, SUBLANE, Co_pad)[:, 0, :].sum(axis=0)   # (Co_pad,)
    total_ssq = pssq.reshape(nt, SUBLANE, Co_pad)[:, 0, :].sum(axis=0)   # (Co_pad,)
    mean = total_sum / m_valid
    # TODO(synk): E[x^2]-E[x]^2 in f32 can cancel when |mean| >> std at very large M;
    #             a Welford-style per-tile (count, mean, M2) combine would be more robust.
    var = jnp.maximum(total_ssq / m_valid - mean * mean, 0.0)   # biased var (train-mode BN)
    scale = (g_p * jax.lax.rsqrt(var + BN_EPS))[None, :]        # (1, Co_pad)
    shift = (b_p - mean * scale[0])[None, :]                    # (1, Co_pad)

    out_pad = pl.pallas_call(
        _matmul_bn_relu_kernel,
        out_shape=jax.ShapeDtypeStruct((M_pad, Co_pad), jnp.float32),
        grid_spec=pltpu.PrefetchScalarGridSpec(
            num_scalar_prefetch=0,
            grid=(nt,),
            in_specs=[
                x_spec,
                w_spec,
                pl.BlockSpec((1, Co_pad), lambda i: (0, 0)),
                pl.BlockSpec((1, Co_pad), lambda i: (0, 0)),
            ],
            out_specs=pl.BlockSpec((tm, Co_pad), lambda i: (i, 0)),
        ),
        compiler_params=cparams,
        cost_estimate=pl.CostEstimate(
            flops=2 * M_pad * Kd * Co_pad,
            transcendentals=0,
            bytes_accessed=M_pad * Kd * 2 + Kd * Co_pad * 2 + M_pad * Co_pad * 4,
        ),
    )(x_p, w_p, scale, shift)

    return out_pad[:m_valid, :Co]


# ----------------------------------------------------------------------------
# im2col glue (plain JAX, emitted directly in bf16 to halve its HBM traffic)
# TODO(synk): full in-kernel im2col (K*K tap accumulation with halo'd DMA tiles)
#             would remove this HBM-materialized (M, C*K*K) matrix entirely.
# ----------------------------------------------------------------------------
def _im2col_2d(x, K, stride, padding):
    # x: (N, C, H, W) -> (N*Ho*Wo, C*K*K), feature order (c, kh, kw) matching w.reshape
    N, C, H, W = x.shape
    xp = jnp.pad(x, ((0, 0), (0, 0), (padding, padding), (padding, padding)))
    Ho = (H + 2 * padding - K) // stride + 1
    Wo = (W + 2 * padding - K) // stride + 1
    taps = []
    for kh in range(K):
        for kw in range(K):
            taps.append(xp[:, :, kh:kh + stride * Ho:stride, kw:kw + stride * Wo:stride])
    cols = jnp.stack(taps, axis=2)                       # (N, C, K*K, Ho, Wo)
    cols = cols.reshape(N, C * K * K, Ho, Wo)
    cols = cols.transpose(0, 2, 3, 1).reshape(N * Ho * Wo, C * K * K)
    return cols, Ho, Wo


def _im2col_1d(x, K, stride, padding):
    # x: (N, C, L) -> (N*Lo, C*K), feature order (c, k)
    N, C, L = x.shape
    xp = jnp.pad(x, ((0, 0), (0, 0), (padding, padding)))
    Lo = (L + 2 * padding - K) // stride + 1
    taps = [xp[:, :, k:k + stride * Lo:stride] for k in range(K)]
    cols = jnp.stack(taps, axis=2)                       # (N, C, K, Lo)
    cols = cols.reshape(N, C * K, Lo)
    cols = cols.transpose(0, 2, 1).reshape(N * Lo, C * K)
    return cols, Lo


@functools.partial(jax.jit, static_argnames=("k", "stride", "pad"))
def _forward_2d(x, w2d, gamma, beta, *, k, stride, pad):
    N = x.shape[0]
    cout = w2d.shape[0]
    cols, Ho, Wo = _im2col_2d(x.astype(jnp.bfloat16), k, stride, pad)
    w_mat = w2d.reshape(cout, -1).T                      # (C*K*K, Co)
    out = _fused_cna_matmul(cols, w_mat, gamma, beta, N * Ho * Wo)   # (N*Ho*Wo, Co)
    # TODO(synk): the NCHW transpose below is an extra HBM pass; emit NHWC directly
    #             if the downstream consumer allows it.
    return out.reshape(N, Ho, Wo, cout).transpose(0, 3, 1, 2)        # -> NCHW


@functools.partial(jax.jit, static_argnames=("k", "stride", "pad"))
def _forward_1d(x, w1d, gamma, beta, *, k, stride, pad):
    N = x.shape[0]
    cout = w1d.shape[0]
    cols, Lo = _im2col_1d(x.astype(jnp.bfloat16), k, stride, pad)
    w_mat = w1d.reshape(cout, -1).T                      # (C*K, Co)
    out = _fused_cna_matmul(cols, w_mat, gamma, beta, N * Lo)        # (N*Lo, Co)
    return out.reshape(N, Lo, cout).transpose(0, 2, 1)               # -> NCL


# ----------------------------------------------------------------------------
# CNA_Block equivalent
# ----------------------------------------------------------------------------
class CNABlock:
    def __init__(self, in_channels, out_channels, kernel_size, stride, padding, key):
        self.cin, self.cout = in_channels, out_channels
        self.k, self.stride, self.pad = kernel_size, stride, padding
        k2d, k1d = jax.random.split(key)
        fan2d = in_channels * kernel_size * kernel_size
        fan1d = in_channels * kernel_size
        self.w2d = jax.random.normal(k2d, (out_channels, in_channels, kernel_size, kernel_size),
                                     jnp.float32) * (1.0 / fan2d) ** 0.5
        self.w1d = jax.random.normal(k1d, (out_channels, in_channels, kernel_size),
                                     jnp.float32) * (1.0 / fan1d) ** 0.5
        # BatchNorm affine params, fresh init (gamma=1, beta=0); training-mode batch stats.
        # TODO(synk): eval-mode BN (running_mean/running_var buffer tracking) is not reproduced.
        self.gamma = jnp.ones((out_channels,), jnp.float32)
        self.beta = jnp.zeros((out_channels,), jnp.float32)

    def __call__(self, x):
        if x.ndim == 4:                                   # image path: NCHW
            return _forward_2d(x, self.w2d, self.gamma, self.beta,
                               k=self.k, stride=self.stride, pad=self.pad)
        else:                                             # audio path: NCL
            return _forward_1d(x, self.w1d, self.gamma, self.beta,
                               k=self.k, stride=self.stride, pad=self.pad)


# ----------------------------------------------------------------------------
# Pure-JAX f32 reference (applies gamma/beta, so the check stays honest if they change)
# ----------------------------------------------------------------------------
def _ref_forward(block, x):
    if x.ndim == 4:
        y = jax.lax.conv_general_dilated(
            x, block.w2d, window_strides=(block.stride, block.stride),
            padding=[(block.pad, block.pad)] * 2,
            dimension_numbers=("NCHW", "OIHW", "NCHW"))
        axes = (0, 2, 3)
        g = block.gamma.reshape(1, -1, 1, 1)
        b = block.beta.reshape(1, -1, 1, 1)
    else:
        y = jax.lax.conv_general_dilated(
            x, block.w1d, window_strides=(block.stride,),
            padding=[(block.pad, block.pad)],
            dimension_numbers=("NCH", "OIH", "NCH"))
        axes = (0, 2)
        g = block.gamma.reshape(1, -1, 1)
        b = block.beta.reshape(1, -1, 1)
    mean = jnp.mean(y, axis=axes, keepdims=True)
    var = jnp.mean((y - mean) ** 2, axis=axes, keepdims=True)
    yh = (y - mean) * jax.lax.rsqrt(var + BN_EPS) * g + b
    return jnp.maximum(yh, 0.0)


if __name__ == "__main__":
    key = jax.random.PRNGKey(0)
    kp, kx2, kx1 = jax.random.split(key, 3)

    in_ch, out_ch, ksz, stride, pad = 4, 8, 3, 1, 1
    block = CNABlock(in_ch, out_ch, ksz, stride, pad, kp)

    # 2D (image) path: NCHW
    x_img = jax.random.normal(kx2, (2, in_ch, 16, 16), jnp.float32)
    y_img = jax.block_until_ready(block(x_img))

    # 1D (audio) path: NCL
    x_aud = jax.random.normal(kx1, (2, in_ch, 8), jnp.float32)
    y_aud = jax.block_until_ready(block(x_aud))

    # Correctness check vs. pure-JAX f32 reference (tolerance widened for bf16 MXU inputs).
    ref_img = _ref_forward(block, x_img)
    ref_aud = _ref_forward(block, x_aud)
    assert y_img.shape == (2, out_ch, 16, 16)
    assert y_aud.shape == (2, out_ch, 8)
    assert jnp.allclose(y_img, ref_img, atol=5e-2, rtol=5e-2)
    assert jnp.allclose(y_aud, ref_aud, atol=5e-2, rtol=5e-2)

    print("KERNEL_OK")
</pallas_src>

<mosaic_0001>
module attributes {stable_mosaic.version = 11 : i64} {
  func.func @_matmul_bn_relu_kernel(%arg0: i32, %arg1: memref<128x36xbf16, #tpu.memory_space<vmem>>, %arg2: memref<36x128xbf16, #tpu.memory_space<vmem>>, %arg3: memref<1x128xf32, #tpu.memory_space<vmem>>, %arg4: memref<1x128xf32, #tpu.memory_space<vmem>>, %arg5: memref<128x128xf32, #tpu.memory_space<vmem>>) attributes {dimension_semantics = [#tpu.dimension_semantics<parallel>], iteration_bounds = array<i64: 4>, scalar_prefetch = 0 : i64, scratch_operands = 0 : i64, tpu.core_type = #tpu.core_type<tc>, window_params = [{transform_indices = @transform_0, window_bounds = array<i64: 128, 36>}, {pipeline_mode = #tpu.pipeline_mode<synchronous>, transform_indices = @transform_1, window_bounds = array<i64: 36, 128>}, {pipeline_mode = #tpu.pipeline_mode<synchronous>, transform_indices = @transform_2, window_bounds = array<i64: 1, 128>}, {pipeline_mode = #tpu.pipeline_mode<synchronous>, transform_indices = @transform_3, window_bounds = array<i64: 1, 128>}, {transform_indices = @transform_4, window_bounds = array<i64: 128, 128>}]} {
    %c0 = arith.constant 0 : index
    %c0_0 = arith.constant 0 : index
    %0 = vector.load %arg1[%c0, %c0_0] : memref<128x36xbf16, #tpu.memory_space<vmem>>, vector<128x36xbf16>
    %c0_1 = arith.constant 0 : index
    %c0_2 = arith.constant 0 : index
    %1 = vector.load %arg2[%c0_1, %c0_2] : memref<36x128xbf16, #tpu.memory_space<vmem>>, vector<36x128xbf16>
    %cst = arith.constant dense<0.000000e+00> : vector<128x128xf32>
    %2 = tpu.matmul %0, %1, %cst {dimension_numbers = #tpu.dot_dimension_numbers<[1], [0], [0], [1], [0, 0, 1, 1], [], []>} : vector<128x36xbf16>, vector<36x128xbf16>, vector<128x128xf32> -> vector<128x128xf32>
    %c0_3 = arith.constant 0 : index
    %c0_4 = arith.constant 0 : index
    %3 = vector.load %arg3[%c0_3, %c0_4] : memref<1x128xf32, #tpu.memory_space<vmem>>, vector<1x128xf32>
    %4 = vector.broadcast %3 : vector<1x128xf32> to vector<128x128xf32>
    %5 = arith.mulf %2, %4 : vector<128x128xf32>
    %c0_5 = arith.constant 0 : index
    %c0_6 = arith.constant 0 : index
    %6 = vector.load %arg4[%c0_5, %c0_6] : memref<1x128xf32, #tpu.memory_space<vmem>>, vector<1x128xf32>
    %7 = vector.broadcast %6 : vector<1x128xf32> to vector<128x128xf32>
    %8 = arith.addf %5, %7 : vector<128x128xf32>
    %cst_7 = arith.constant 0.000000e+00 : f32
    %9 = vector.broadcast %cst_7 : f32 to vector<128x128xf32>
    %10 = arith.maximumf %8, %9 : vector<128x128xf32>
    %c0_8 = arith.constant 0 : index
    %c0_9 = arith.constant 0 : index
    %11 = vector.load %arg5[%c0_8, %c0_9] : memref<128x128xf32, #tpu.memory_space<vmem>>, vector<128x128xf32>
    tpu.vector_store %arg5[%c0_8, %c0_9], %10 {strides = array<i32>} : memref<128x128xf32, #tpu.memory_space<vmem>>, vector<128x128xf32>,
    return
  }
  func.func @transform_0(%arg0: i32) -> (i32, i32) {
    %c0_i32 = arith.constant 0 : i32
    %c0_i32_0 = arith.constant 0 : i32
    return %arg0, %c0_i32 : i32, i32
  }
  func.func @transform_1(%arg0: i32) -> (i32, i32) {
    %c0_i32 = arith.constant 0 : i32
    %c0_i32_0 = arith.constant 0 : i32
    %c0_i32_1 = arith.constant 0 : i32
    return %c0_i32, %c0_i32_0 : i32, i32
  }
  func.func @transform_2(%arg0: i32) -> (i32, i32) {
    %c0_i32 = arith.constant 0 : i32
    %c0_i32_0 = arith.constant 0 : i32
    %c0_i32_1 = arith.constant 0 : i32
    return %c0_i32, %c0_i32_0 : i32, i32
  }
  func.func @transform_3(%arg0: i32) -> (i32, i32) {
    %c0_i32 = arith.constant 0 : i32
    %c0_i32_0 = arith.constant 0 : i32
    %c0_i32_1 = arith.constant 0 : i32
    return %c0_i32, %c0_i32_0 : i32, i32
  }
  func.func @transform_4(%arg0: i32) -> (i32, i32) {
    %c0_i32 = arith.constant 0 : i32
    %c0_i32_0 = arith.constant 0 : i32
    return %arg0, %c0_i32 : i32, i32
  }
}

module attributes {stable_mosaic.version = 11 : i64} {
  func.func @_stats_kernel(%arg0: i32, %arg1: memref<128x36xbf16, #tpu.memory_space<vmem>>, %arg2: memref<36x128xbf16, #tpu.memory_space<vmem>>, %arg3: memref<8x128xf32, #tpu.memory_space<vmem>>, %arg4: memref<8x128xf32, #tpu.memory_space<vmem>>) attributes {dimension_semantics = [#tpu.dimension_semantics<parallel>], iteration_bounds = array<i64: 4>, scalar_prefetch = 0 : i64, scratch_operands = 0 : i64, tpu.core_type = #tpu.core_type<tc>, window_params = [{transform_indices = @transform_0, window_bounds = array<i64: 128, 36>}, {pipeline_mode = #tpu.pipeline_mode<synchronous>, transform_indices = @transform_1, window_bounds = array<i64: 36, 128>}, {transform_indices = @transform_2, window_bounds = array<i64: 8, 128>}, {transform_indices = @transform_3, window_bounds = array<i64: 8, 128>}]} {
    %c0 = arith.constant 0 : index
    %c0_0 = arith.constant 0 : index
    %0 = vector.load %arg1[%c0, %c0_0] : memref<128x36xbf16, #tpu.memory_space<vmem>>, vector<128x36xbf16>
    %c0_1 = arith.constant 0 : index
    %c0_2 = arith.constant 0 : index
    %1 = vector.load %arg2[%c0_1, %c0_2] : memref<36x128xbf16, #tpu.memory_space<vmem>>, vector<36x128xbf16>
    %cst = arith.constant dense<0.000000e+00> : vector<128x128xf32>
    %2 = tpu.matmul %0, %1, %cst {dimension_numbers = #tpu.dot_dimension_numbers<[1], [0], [0], [1], [0, 0, 1, 1], [], []>} : vector<128x36xbf16>, vector<36x128xbf16>, vector<128x128xf32> -> vector<128x128xf32>
    %cst_3 = arith.constant dense<0.000000e+00> : vector<128xf32>
    %3 = vector.multi_reduction <add>, %2, %cst_3 [0] : vector<128x128xf32> to vector<128xf32>
    %4 = vector.shape_cast %3 : vector<128xf32> to vector<1x128xf32>
    %5 = arith.mulf %2, %2 : vector<128x128xf32>
    %cst_4 = arith.constant dense<0.000000e+00> : vector<128xf32>
    %6 = vector.multi_reduction <add>, %5, %cst_4 [0] : vector<128x128xf32> to vector<128xf32>
    %7 = vector.shape_cast %6 : vector<128xf32> to vector<1x128xf32>
    %8 = vector.shape_cast %4 : vector<1x128xf32> to vector<1x128xf32>
    %9 = vector.broadcast %8 : vector<1x128xf32> to vector<8x128xf32>
    %c0_5 = arith.constant 0 : index
    %c0_6 = arith.constant 0 : index
    %10 = vector.load %arg3[%c0_5, %c0_6] : memref<8x128xf32, #tpu.memory_space<vmem>>, vector<8x128xf32>
    tpu.vector_store %arg3[%c0_5, %c0_6], %9 {strides = array<i32>} : memref<8x128xf32, #tpu.memory_space<vmem>>, vector<8x128xf32>,
    %11 = vector.shape_cast %7 : vector<1x128xf32> to vector<1x128xf32>
    %12 = vector.broadcast %11 : vector<1x128xf32> to vector<8x128xf32>
    %c0_7 = arith.constant 0 : index
    %c0_8 = arith.constant 0 : index
    %13 = vector.load %arg4[%c0_7, %c0_8] : memref<8x128xf32, #tpu.memory_space<vmem>>, vector<8x128xf32>
    tpu.vector_store %arg4[%c0_7, %c0_8], %12 {strides = array<i32>} : memref<8x128xf32, #tpu.memory_space<vmem>>, vector<8x128xf32>,
    return
  }
  func.func @transform_0(%arg0: i32) -> (i32, i32) {
    %c0_i32 = arith.constant 0 : i32
    %c0_i32_0 = arith.constant 0 : i32
    return %arg0, %c0_i32 : i32, i32
  }
  func.func @transform_1(%arg0: i32) -> (i32, i32) {
    %c0_i32 = arith.constant 0 : i32
    %c0_i32_0 = arith.constant 0 : i32
    %c0_i32_1 = arith.constant 0 : i32
    return %c0_i32, %c0_i32_0 : i32, i32
  }
  func.func @transform_2(%arg0: i32) -> (i32, i32) {
    %c0_i32 = arith.constant 0 : i32
    %c0_i32_0 = arith.constant 0 : i32
    return %arg0, %c0_i32 : i32, i32
  }
  func.func @transform_3(%arg0: i32) -> (i32, i32) {
    %c0_i32 = arith.constant 0 : i32
    %c0_i32_0 = arith.constant 0 : i32
    return %arg0, %c0_i32 : i32, i32
  }
}

</mosaic_0001>

<bundles_post_ra>
// kernel: _forward_2d.2
= control target key start
LH: loop header
LB: loop body
LE: loop exit
PB: predicated region body
PF: predicated region fallthrough
CT: control target
= control target key end

     0   :  { %s595_s12 = smov 0   ;;  %s637_s0 = inlined_call_operand.vmem [shape: bf16[512,36], index: 0, kind: input, shape index: {}]   ;;  %s638_s1 = inlined_call_operand.vmem [shape: bf16[36,128], index: 1, kind: input, shape index: {}]   ;;  %s639_s2 = inlined_call_operand.vmem [shape: f32[32,128], index: 2, kind: output, shape index: {0}]   ;;  %s640_s3 = inlined_call_operand.vmem [shape: f32[32,128], index: 3, kind: output, shape index: {1}]  }
   0x1 LB: > { %s601_s13 = sadd.s32 4294967295, %s573_s12   ;;  %p485_p0 = scmp.ge.s32.totalorder %s573_s12, 1  ;;  %s573_s12 = sphi %s595_s12, %s14_s12  }
   0x2   : > { %p141_p1 = scmp.lt.s32.totalorder %s573_s12, 5 }
   0x4   : > { %p142_p2 = pnand %p485_p0, %p141_p1 }
   0x5   : > { %s486_s16 = sshll.u32 (!%p142_p2), %s601_s13, 4  ;;  %p174_p4 = scmp.lt.s32.totalorder (!%p142_p2), %s601_s13, 3 }
   0x6   : > { %145 = sbr.rel (%p142_p2) target bundleno = 219 (0xdb), region = 28  ;;  %p169_p3 = scmp.lt.s32.totalorder (!%p142_p2), %s486_s16, 63 }
   0xb   : > { %v203_v0 = vld [vmem:[%s638_s1 + $0x10] sm:$0x3]  ;;  %vm284_vm0 = vcmask 1041408   ;;  %s642_s16 = smov (!%p169_p3, %s486_s16), 63  ;;  %v549_v4 = vld [vmem:[%s638_s1 + $0x8] sm:$0xff]  ;;  %v548_v5 = vld [vmem:[%s638_s1] sm:$0xff] }
   0xc   : > { %v253_v1 = vunpack.c.l.b16 %v203_v0  ;;  %s487_s19 = sshll.u32 %s642_s16, 2  ;;  %vm259_vm1 = vcmask 293888   ;;  %s644_s13 = smov (!%p174_p4, %s601_s13), 3 }
   0xd   : > { %s172_s24 = scalar_lea.vmem %s637_s0, %s487_s19  ;;  %s488_s25 = sshll.u32 %s644_s13, 3 }
   0xe   : > { %v256_v2 = vpack.c.b16 %v253_v1, %v253_v1  ;;  %v540_v6 = vld [vmem:[%s172_s24] sm:$0xff]  ;;  %v542_v7 = vld [vmem:[%s172_s24 + $0x10] sm:$0xff]  ;;  %v541_v10 = vld [vmem:[%s172_s24 + $0x8] sm:$0xff]  ;;  %s177_s28 = scalar_lea.vmem %s639_s2, %s488_s25  ;;  %s181_s4 = scalar_lea.vmem %s640_s3, %s488_s25 }
   0xf   : > { %v544_v8 = vld [vmem:[%s172_s24 + $0x20] sm:$0xff]  ;;  %v546_v9 = vld [vmem:[%s172_s24 + $0x30] sm:$0xff]  ;;  %v543_v11 = vld [vmem:[%s172_s24 + $0x18] sm:$0xff] }
  0x10   : > { %v286_v3 = vsel %vm284_vm0, %v256_v2, 0  ;;  %v545_v12 = vld [vmem:[%s172_s24 + $0x28] sm:$0xff]  ;;  %v547_v13 = vld [vmem:[%s172_s24 + $0x38] sm:$0xff] }
  0x11   : > { %293 = vmatpush.bf16.msra.mxu0 %v286_v3  ;;  %550 = vmatpush.bf16.msra.mxu1 %v286_v3 }
  0x12   : > { %551 = vmatpush.bf16.msra.mxu2 %v286_v3  ;;  %552 = vmatpush.bf16.msra.mxu3 %v286_v3 }
  0x15   : > { %294 = vmatpush.bf16.msra.mxu0 %v549_v4  ;;  %553 = vmatpush.bf16.msra.mxu1 %v549_v4 }
  0x16   : > { %554 = vmatpush.bf16.msra.mxu2 %v549_v4  ;;  %555 = vmatpush.bf16.msra.mxu3 %v549_v4 }
  0x19   : > { %295 = vmatpush.bf16.msra.mxu0 %v548_v5  ;;  %556 = vmatpush.bf16.msra.mxu1 %v548_v5 }
  0x1a   : > { %557 = vmatpush.bf16.msra.mxu2 %v548_v5  ;;  %558 = vmatpush.bf16.msra.mxu3 %v548_v5 }
  0x1c   : > { %530 = vmatmul.msk.bf16.vlgmr.msra.gmra.mxu0 %vm259_vm1, %v540_v6  ;;  %532 = vmatmul.msk.bf16.vlgmr.msra.gmra.mxu1 %vm259_vm1, %v542_v7 }
  0x1d   : > { %534 = vmatmul.msk.bf16.vlgmr.msra.gmra.mxu2 %vm259_vm1, %v544_v8  ;;  %536 = vmatmul.msk.bf16.vlgmr.msra.gmra.mxu3 %vm259_vm1, %v546_v9 }
  0x2c   : > { %531 = vmatmul.msk.bf16.gmra.mxu0 %vm259_vm1, %v541_v10  ;;  %533 = vmatmul.msk.bf16.gmra.mxu1 %vm259_vm1, %v543_v11 }
  0x2d   : > { %535 = vmatmul.msk.bf16.gmra.mxu2 %vm259_vm1, %v545_v12  ;;  %537 = vmatmul.msk.bf16.gmra.mxu3 %vm259_vm1, %v547_v13 }
  0x99   : > { %v297_v14 = vpop.f32.mrf.mxu0  ;;  %v307_v15 = vpop.f32.mrf.mxu1 }
  0x9a   : > { %v358_v24 = vmul.f32 %v297_v14, %v297_v14  ;;  %v362_v34 = vmul.f32 %v307_v15, %v307_v15 }
  0xa0   : > { %v317_v17 = vpop.f32.mrf.mxu2  ;;  %v327_v20 = vpop.f32.mrf.mxu3 }
  0xa1   : > { %v299_v16 = vpop.f32.mrf.mxu0  ;;  %v309_v18 = vpop.f32.mrf.mxu1  ;;  %v366_v48 = vmul.f32 %v317_v17, %v317_v17  ;;  %v370_v62 = vmul.f32 %v327_v20, %v327_v20 }
  0xa2   : > { %v359_v22 = vmul.f32 %v299_v16, %v299_v16  ;;  %v337_v25 = vadd.f32 %v299_v16, %v297_v14  ;;  %v363_v38 = vmul.f32 %v309_v18, %v309_v18 }
  0xa4   : > { %v374_v27 = vadd.f32 %v359_v22, %v358_v24 }
  0xa8   : > { %v319_v21 = vpop.f32.mrf.mxu2  ;;  %v329_v33 = vpop.f32.mrf.mxu3 }
  0xa9   : > { %v302_v19 = vpop.f32.mrf.mxu0  ;;  %v312_v23 = vpop.f32.mrf.mxu1  ;;  %v367_v52 = vmul.f32 %v319_v21, %v319_v21  ;;  %v371_v1 = vmul.f32 %v329_v33, %v329_v33 }
  0xaa   : > { %v360_v26 = vmul.f32 %v302_v19, %v302_v19  ;;  %v338_v28 = vadd.f32 %v337_v25, %v302_v19  ;;  %v364_v42 = vmul.f32 %v312_v23, %v312_v23 }
  0xac   : > { %v375_v30 = vadd.f32 %v374_v27, %v360_v26 }
  0xb0   : > { %v322_v37 = vpop.f32.mrf.mxu2  ;;  %v332_v51 = vpop.f32.mrf.mxu3 }
  0xb1   : > { %v304_v29 = vpop.f32.mrf.mxu0  ;;  %v314_v41 = vpop.f32.mrf.mxu1  ;;  %v368_v57 = vmul.f32 %v322_v37, %v322_v37  ;;  %v372_v6 = vmul.f32 %v332_v51, %v332_v51 }
  0xb2   : > { %v339_v31 = vadd.f32 %v338_v28, %v304_v29  ;;  %v361_v32 = vmul.f32 %v304_v29, %v304_v29  ;;  %v365_v46 = vmul.f32 %v314_v41, %v314_v41 }
  0xb4   : > { %v340_v35 = vadd.f32 %v339_v31, %v307_v15  ;;  %v376_v36 = vadd.f32 %v375_v30, %v361_v32 }
  0xb6   : > { %v377_v39 = vadd.f32 %v376_v36, %v362_v34  ;;  %v341_v40 = vadd.f32 %v340_v35, %v309_v18 }
  0xb8   : > { %v342_v43 = vadd.f32 %v341_v40, %v312_v23  ;;  %v378_v44 = vadd.f32 %v377_v39, %v363_v38  ;;  %v324_v55 = vpop.f32.mrf.mxu2  ;;  %v334_v4 = vpop.f32.mrf.mxu3 }
  0xb9   : > { %v369_v61 = vmul.f32 %v324_v55, %v324_v55  ;;  %v373_v10 = vmul.f32 %v334_v4, %v334_v4 }
  0xba   : > { %v343_v45 = vadd.f32 %v342_v43, %v314_v41  ;;  %v379_v47 = vadd.f32 %v378_v44, %v364_v42 }
  0xbc   : > { %v344_v49 = vadd.f32 %v343_v45, %v317_v17  ;;  %v380_v50 = vadd.f32 %v379_v47, %v365_v46 }
  0xbe   : > { %v381_v53 = vadd.f32 %v380_v50, %v366_v48  ;;  %v345_v54 = vadd.f32 %v344_v49, %v319_v21 }
  0xc0   : > { %v346_v56 = vadd.f32 %v345_v54, %v322_v37  ;;  %v382_v58 = vadd.f32 %v381_v53, %v367_v52 }
  0xc2   : > { %v383_v59 = vadd.f32 %v382_v58, %v368_v57  ;;  %v347_v60 = vadd.f32 %v346_v56, %v324_v55 }
  0xc4   : > { %v348_v63 = vadd.f32 %v347_v60, %v327_v20  ;;  %v384_v0 = vadd.f32 %v383_v59, %v369_v61 }
  0xc6   : > { %v385_v2 = vadd.f32 %v384_v0, %v370_v62  ;;  %v349_v3 = vadd.f32 %v348_v63, %v329_v33 }
  0xc8   : > { %v350_v5 = vadd.f32 %v349_v3, %v332_v51  ;;  %v386_v7 = vadd.f32 %v385_v2, %v371_v1 }
  0xca   : > { %v387_v8 = vadd.f32 %v386_v7, %v372_v6  ;;  %v351_v9 = vadd.f32 %v350_v5, %v334_v4 }
  0xcc   : > { %v352_v11 = vrot.slane %v351_v9, 4  ;;  %v388_v12 = vadd.f32 %v387_v8, %v373_v10 }
  0xce   : > { %v353_v13 = vadd.f32 %v352_v11, %v351_v9  ;;  %v389_v14 = vrot.slane %v388_v12, 4 }
  0xd0   : > { %v354_v15 = vrot.slane %v353_v13, 2  ;;  %v390_v16 = vadd.f32 %v389_v14, %v388_v12 }
  0xd2   : > { %v355_v17 = vadd.f32 %v354_v15, %v353_v13  ;;  %v391_v18 = vrot.slane %v390_v16, 2 }
  0xd4   : > { %v356_v19 = vrot.slane %v355_v17, 1  ;;  %v392_v20 = vadd.f32 %v391_v18, %v390_v16 }
  0xd6   : > { %v357_v21 = vadd.f32 %v356_v19, %v355_v17  ;;  %v393_v22 = vrot.slane %v392_v20, 1 }
  0xd8   : > { %v394_v23 = vadd.f32 %v393_v22, %v392_v20  ;;  %395 = vst [vmem:[%s177_s28] sm:$0xff] %v357_v21 }
  0xda   : > { %396 = vst [vmem:[%s181_s4] sm:$0xff] %v394_v23 }
  0xdb PF: > { %s14_s12 = sadd.s32 1, %s573_s12  }
  0xdc   : > { %p11_p5 = scmp.ge.s32.totalorder %s14_s12, 6  }
  0xde   :  { %13 = sbr.rel (!%p11_p5) target bundleno = 1 (0x1), region = 70 }

// kernel: _forward_2d.3
= control target key start
LH: loop header
LB: loop body
LE: loop exit
PB: predicated region body
PF: predicated region fallthrough
CT: control target
= control target key end

     0   :  { %s605_s15 = smov 0   ;;  %s703_s0 = inlined_call_operand.vmem [shape: bf16[512,36], index: 0, kind: input, shape index: {}]   ;;  %s704_s1 = inlined_call_operand.vmem [shape: bf16[36,128], index: 1, kind: input, shape index: {}]   ;;  %s705_s2 = inlined_call_operand.vmem [shape: f32[1,128], index: 2, kind: input, shape index: {}]   ;;  %s706_s3 = inlined_call_operand.vmem [shape: f32[1,128], index: 3, kind: input, shape index: {}]   ;;  %s707_s4 = inlined_call_operand.vmem [shape: f32[512,128], index: 4, kind: output, shape index: {}]  }
   0x1 LB: > { %s484_s16 = sadd.s32 4294967295, %s578_s15   ;;  %p488_p0 = scmp.ge.s32.totalorder %s578_s15, 1  ;;  %s578_s15 = sphi %s605_s15, %s14_s15  }
   0x2   : > { %p163_p1 = scmp.lt.s32.totalorder %s578_s15, 5 }
   0x4   : > { %p164_p2 = pnand %p488_p0, %p163_p1 }
   0x5   : > { %s489_s19 = sshll.u32 (!%p164_p2), %s484_s16, 4 }
   0x6   : > { %167 = sbr.rel (%p164_p2) target bundleno = 193 (0xc1), region = 36  ;;  %p190_p3 = scmp.lt.s32.totalorder (!%p164_p2), %s489_s19, 63 }
   0xb   : > { %v222_v0 = vld [vmem:[%s704_s1 + $0x10] sm:$0x3]  ;;  %vm303_vm0 = vcmask 1041408   ;;  %s709_s19 = smov (!%p190_p3, %s489_s19), 63  ;;  %v552_v4 = vld [vmem:[%s704_s1 + $0x8] sm:$0xff]  ;;  %v551_v5 = vld [vmem:[%s704_s1] sm:$0xff] }
   0xc   : > { %v272_v1 = vunpack.c.l.b16 %v222_v0  ;;  %s490_s22 = sshll.u32 %s709_s19, 2  ;;  %vm278_vm1 = vcmask 293888   ;;  %v639_v14 = vld [vmem:[%s705_s2] ss:$0 sm:$0xff]  ;;  %s492_s6 = sshll.u32 %s709_s19, 3 }
   0xd   : > { %s193_s27 = scalar_lea.vmem %s703_s0, %s490_s22  ;;  %v644_v15 = vld [vmem:[%s706_s3] ss:$0 sm:$0xff]  ;;  %s654_s9 = scalar_lea.vmem %s707_s4, %s492_s6 }
   0xe   : > { %v275_v2 = vpack.c.b16 %v272_v1, %v272_v1  ;;  %v543_v6 = vld [vmem:[%s193_s27] sm:$0xff]  ;;  %v545_v7 = vld [vmem:[%s193_s27 + $0x10] sm:$0xff]  ;;  %v544_v10 = vld [vmem:[%s193_s27 + $0x8] sm:$0xff] }
   0xf   : > { %v547_v8 = vld [vmem:[%s193_s27 + $0x20] sm:$0xff]  ;;  %v549_v9 = vld [vmem:[%s193_s27 + $0x30] sm:$0xff]  ;;  %v546_v11 = vld [vmem:[%s193_s27 + $0x18] sm:$0xff] }
  0x10   : > { %v305_v3 = vsel %vm303_vm0, %v275_v2, 0  ;;  %v548_v12 = vld [vmem:[%s193_s27 + $0x28] sm:$0xff]  ;;  %v550_v13 = vld [vmem:[%s193_s27 + $0x38] sm:$0xff] }
  0x11   : > { %312 = vmatpush.bf16.msra.mxu0 %v305_v3  ;;  %553 = vmatpush.bf16.msra.mxu1 %v305_v3 }
  0x12   : > { %554 = vmatpush.bf16.msra.mxu2 %v305_v3  ;;  %555 = vmatpush.bf16.msra.mxu3 %v305_v3 }
  0x15   : > { %313 = vmatpush.bf16.msra.mxu0 %v552_v4  ;;  %556 = vmatpush.bf16.msra.mxu1 %v552_v4 }
  0x16   : > { %557 = vmatpush.bf16.msra.mxu2 %v552_v4  ;;  %558 = vmatpush.bf16.msra.mxu3 %v552_v4 }
  0x19   : > { %314 = vmatpush.bf16.msra.mxu0 %v551_v5  ;;  %559 = vmatpush.bf16.msra.mxu1 %v551_v5 }
  0x1a   : > { %560 = vmatpush.bf16.msra.mxu2 %v551_v5  ;;  %561 = vmatpush.bf16.msra.mxu3 %v551_v5 }
  0x1c   : > { %533 = vmatmul.msk.bf16.vlgmr.msra.gmra.mxu0 %vm278_vm1, %v543_v6  ;;  %535 = vmatmul.msk.bf16.vlgmr.msra.gmra.mxu1 %vm278_vm1, %v545_v7 }
  0x1d   : > { %537 = vmatmul.msk.bf16.vlgmr.msra.gmra.mxu2 %vm278_vm1, %v547_v8  ;;  %539 = vmatmul.msk.bf16.vlgmr.msra.gmra.mxu3 %vm278_vm1, %v549_v9 }
  0x2c   : > { %534 = vmatmul.msk.bf16.gmra.mxu0 %vm278_vm1, %v544_v10  ;;  %536 = vmatmul.msk.bf16.gmra.mxu1 %vm278_vm1, %v546_v11 }
  0x2d   : > { %538 = vmatmul.msk.bf16.gmra.mxu2 %vm278_vm1, %v548_v12  ;;  %540 = vmatmul.msk.bf16.gmra.mxu3 %vm278_vm1, %v550_v13 }
  0x99   : > { %v316_v16 = vpop.f32.mrf.mxu0  ;;  %v326_v17 = vpop.f32.mrf.mxu1 }
  0x9a   : > { %v360_v18 = vmul.f32 %v639_v14, %v316_v16  ;;  %v364_v19 = vmul.f32 %v639_v14, %v326_v17 }
  0x9c   : > { %v380_v20 = vadd.f32 %v644_v15, %v360_v18  ;;  %v384_v21 = vadd.f32 %v644_v15, %v364_v19 }
  0x9e   : > { %v396_v22 = vmax.f32 %v380_v20, 0.0  ;;  %v400_v23 = vmax.f32 %v384_v21, 0.0 }
  0xa0   : > { %412 = vst [vmem:[%s654_s9] sm:$0xff] %v396_v22  ;;  %v336_v24 = vpop.f32.mrf.mxu2  ;;  %v346_v25 = vpop.f32.mrf.mxu3 }
  0xa1   : > { %416 = vst [vmem:[%s654_s9 + $0x20] sm:$0xff] %v400_v23  ;;  %v368_v26 = vmul.f32 %v639_v14, %v336_v24  ;;  %v372_v27 = vmul.f32 %v639_v14, %v346_v25  ;;  %v318_v28 = vpop.f32.mrf.mxu0  ;;  %v328_v29 = vpop.f32.mrf.mxu1 }
  0xa2   : > { %v361_v30 = vmul.f32 %v639_v14, %v318_v28  ;;  %v365_v31 = vmul.f32 %v639_v14, %v328_v29 }
  0xa3   : > { %v388_v32 = vadd.f32 %v644_v15, %v368_v26  ;;  %v392_v33 = vadd.f32 %v644_v15, %v372_v27 }
  0xa4   : > { %v381_v34 = vadd.f32 %v644_v15, %v361_v30  ;;  %v385_v35 = vadd.f32 %v644_v15, %v365_v31 }
  0xa5   : > { %v404_v36 = vmax.f32 %v388_v32, 0.0  ;;  %v408_v37 = vmax.f32 %v392_v33, 0.0 }
  0xa6   : > { %v397_v38 = vmax.f32 %v381_v34, 0.0  ;;  %v401_v39 = vmax.f32 %v385_v35, 0.0 }
  0xa7   : > { %420 = vst [vmem:[%s654_s9 + $0x40] sm:$0xff] %v404_v36 }
  0xa8   : > { %424 = vst [vmem:[%s654_s9 + $0x60] sm:$0xff] %v408_v37  ;;  %v338_v40 = vpop.f32.mrf.mxu2  ;;  %v348_v41 = vpop.f32.mrf.mxu3 }
  0xa9   : > { %413 = vst [vmem:[%s654_s9 + $0x8] sm:$0xff] %v397_v38  ;;  %v369_v42 = vmul.f32 %v639_v14, %v338_v40  ;;  %v373_v43 = vmul.f32 %v639_v14, %v348_v41  ;;  %v321_v44 = vpop.f32.mrf.mxu0  ;;  %v331_v45 = vpop.f32.mrf.mxu1 }
  0xaa   : > { %417 = vst [vmem:[%s654_s9 + $0x28] sm:$0xff] %v401_v39  ;;  %v362_v46 = vmul.f32 %v639_v14, %v321_v44  ;;  %v366_v47 = vmul.f32 %v639_v14, %v331_v45 }
  0xab   : > { %v389_v48 = vadd.f32 %v644_v15, %v369_v42  ;;  %v393_v49 = vadd.f32 %v644_v15, %v373_v43 }
  0xac   : > { %v382_v50 = vadd.f32 %v644_v15, %v362_v46  ;;  %v386_v51 = vadd.f32 %v644_v15, %v366_v47 }
  0xad   : > { %v405_v52 = vmax.f32 %v389_v48, 0.0  ;;  %v409_v53 = vmax.f32 %v393_v49, 0.0 }
  0xae   : > { %v398_v54 = vmax.f32 %v382_v50, 0.0  ;;  %v402_v55 = vmax.f32 %v386_v51, 0.0 }
  0xaf   : > { %421 = vst [vmem:[%s654_s9 + $0x48] sm:$0xff] %v405_v52 }
  0xb0   : > { %425 = vst [vmem:[%s654_s9 + $0x68] sm:$0xff] %v409_v53  ;;  %v341_v56 = vpop.f32.mrf.mxu2  ;;  %v351_v57 = vpop.f32.mrf.mxu3 }
  0xb1   : > { %414 = vst [vmem:[%s654_s9 + $0x10] sm:$0xff] %v398_v54  ;;  %v370_v58 = vmul.f32 %v639_v14, %v341_v56  ;;  %v374_v59 = vmul.f32 %v639_v14, %v351_v57  ;;  %v323_v60 = vpop.f32.mrf.mxu0  ;;  %v333_v61 = vpop.f32.mrf.mxu1 }
  0xb2   : > { %418 = vst [vmem:[%s654_s9 + $0x30] sm:$0xff] %v402_v55  ;;  %v363_v62 = vmul.f32 %v639_v14, %v323_v60  ;;  %v367_v63 = vmul.f32 %v639_v14, %v333_v61 }
  0xb3   : > { %v390_v0 = vadd.f32 %v644_v15, %v370_v58  ;;  %v394_v1 = vadd.f32 %v644_v15, %v374_v59 }
  0xb4   : > { %v383_v2 = vadd.f32 %v644_v15, %v363_v62  ;;  %v387_v3 = vadd.f32 %v644_v15, %v367_v63 }
  0xb5   : > { %v406_v4 = vmax.f32 %v390_v0, 0.0  ;;  %v410_v5 = vmax.f32 %v394_v1, 0.0 }
  0xb6   : > { %v399_v6 = vmax.f32 %v383_v2, 0.0  ;;  %v403_v7 = vmax.f32 %v387_v3, 0.0 }
  0xb7   : > { %422 = vst [vmem:[%s654_s9 + $0x50] sm:$0xff] %v406_v4 }
  0xb8   : > { %426 = vst [vmem:[%s654_s9 + $0x70] sm:$0xff] %v410_v5  ;;  %v343_v8 = vpop.f32.mrf.mxu2  ;;  %v353_v9 = vpop.f32.mrf.mxu3 }
  0xb9   : > { %415 = vst [vmem:[%s654_s9 + $0x18] sm:$0xff] %v399_v6  ;;  %v371_v10 = vmul.f32 %v639_v14, %v343_v8  ;;  %v375_v11 = vmul.f32 %v639_v14, %v353_v9 }
  0xba   : > { %419 = vst [vmem:[%s654_s9 + $0x38] sm:$0xff] %v403_v7 }
  0xbb   : > { %v391_v12 = vadd.f32 %v644_v15, %v371_v10  ;;  %v395_v13 = vadd.f32 %v644_v15, %v375_v11 }
  0xbd   : > { %v407_v16 = vmax.f32 %v391_v12, 0.0  ;;  %v411_v17 = vmax.f32 %v395_v13, 0.0 }
  0xbf   : > { %423 = vst [vmem:[%s654_s9 + $0x58] sm:$0xff] %v407_v16 }
  0xc0   : > { %427 = vst [vmem:[%s654_s9 + $0x78] sm:$0xff] %v411_v17 }
  0xc1 PF: > { %s14_s15 = sadd.s32 1, %s578_s15  }
  0xc2   : > { %p11_p4 = scmp.ge.s32.totalorder %s14_s15, 6  }
  0xc4   :  { %13 = sbr.rel (!%p11_p4) target bundleno = 1 (0x1), region = 66 }

</bundles_post_ra>
